<compile_context>
chip_gen: v7x
topology: tpu7x:2x2x1
jax: 0.10.0
libtpu: 0.0.40
codegen_flags: <defaults>
</compile_context>

<pallas_src>
import jax
import jax.numpy as jnp
from jax.experimental import pallas as pl
from jax.experimental.pallas import tpu as pltpu

IN_DIM = 28 * 28          # 784 (== full last dim of x, no K padding)
HID_DIM = 64
OUT_DIM = 3
OUT_PAD = 128             # lane-dense padded output width
TM_DEFAULT = 1024         # batch tile (rows per grid step)


def encoder_kernel(x_ref, w1_ref, b1_ref, w2_ref, b2_ref, o_ref):
    # Cast x to bf16 in VMEM right before the MXU (x read from HBM once, f32).
    x_bf = x_ref[...].astype(jnp.bfloat16)
    # Linear(784->64): bf16 x bf16 on the MXU, f32 accumulate.
    h = jnp.dot(x_bf, w1_ref[...], preferred_element_type=jnp.float32)
    # Bias + ReLU in f32 on the VPU.
    h = jnp.maximum(h + b1_ref[...], 0.0)
    # Linear(64->3), output padded to 128 lanes; bf16 operands, f32 accumulate.
    y = jnp.dot(h.astype(jnp.bfloat16), w2_ref[...],
                preferred_element_type=jnp.float32)
    o_ref[...] = (y + b2_ref[...]).astype(o_ref.dtype)


def prepare_params(w1, b1, w2, b2):
    """One-time offline prep: cast MXU weights to bf16, pad N (3 -> 128)."""
    w1p = w1.astype(jnp.bfloat16)                                   # (784, 64)
    b1p = b1.astype(jnp.float32).reshape(1, HID_DIM)                # (1, 64)
    w2p = jnp.zeros((HID_DIM, OUT_PAD), jnp.float32)
    w2p = w2p.at[:, :OUT_DIM].set(w2).astype(jnp.bfloat16)          # (64, 128)
    b2p = jnp.zeros((1, OUT_PAD), jnp.float32)
    b2p = b2p.at[:, :OUT_DIM].set(b2.reshape(1, OUT_DIM))           # (1, 128)
    return w1p, b1p, w2p, b2p


def encoder_forward(x, w1p, b1p, w2p, b2p, *, tm=TM_DEFAULT):
    B = x.shape[0]
    # Pad the batch only to a sublane multiple (at most 7 zero rows).
    B8 = ((B + 7) // 8) * 8
    xp = x if B8 == B else jnp.pad(x, ((0, B8 - B), (0, 0)))

    tm_eff = min(tm, B8)
    n_steps = pl.cdiv(B8, tm_eff)   # last tile may be partial -> rows masked

    cost = pl.CostEstimate(
        flops=2 * B8 * IN_DIM * HID_DIM + 2 * B8 * HID_DIM * OUT_PAD,
        transcendentals=0,
        bytes_accessed=(B8 * IN_DIM * 4            # x (f32, single pass)
                        + IN_DIM * HID_DIM * 2     # w1 (bf16)
                        + HID_DIM * OUT_PAD * 2    # w2 (bf16)
                        + B8 * OUT_PAD * 4),       # output (f32)
    )

    out_padded = pl.pallas_call(
        encoder_kernel,
        out_shape=jax.ShapeDtypeStruct((B8, OUT_PAD), jnp.float32),
        grid_spec=pl.GridSpec(
            grid=(n_steps,),
            in_specs=[
                pl.BlockSpec((tm_eff, IN_DIM), lambda i: (i, 0)),    # x tile moves
                pl.BlockSpec((IN_DIM, HID_DIM), lambda i: (0, 0)),   # resident weights
                pl.BlockSpec((1, HID_DIM), lambda i: (0, 0)),
                pl.BlockSpec((HID_DIM, OUT_PAD), lambda i: (0, 0)),
                pl.BlockSpec((1, OUT_PAD), lambda i: (0, 0)),
            ],
            out_specs=pl.BlockSpec((tm_eff, OUT_PAD), lambda i: (i, 0)),
        ),
        compiler_params=pltpu.CompilerParams(
            dimension_semantics=("parallel",),
        ),
        cost_estimate=cost,
    )(xp, w1p, b1p, w2p, b2p)

    # Drop padded batch rows and padded output lanes.
    return out_padded[:B, :OUT_DIM]


def init_params(key):
    # Deterministic init mimicking torch.nn.Linear default:
    # U(-1/sqrt(fan_in), 1/sqrt(fan_in)) for both weight and bias.
    k1, k2, k3, k4 = jax.random.split(key, 4)
    bound1 = 1.0 / jnp.sqrt(jnp.float32(IN_DIM))
    bound2 = 1.0 / jnp.sqrt(jnp.float32(HID_DIM))
    w1 = jax.random.uniform(k1, (IN_DIM, HID_DIM), jnp.float32, -bound1, bound1)
    b1 = jax.random.uniform(k2, (1, HID_DIM), jnp.float32, -bound1, bound1)
    w2 = jax.random.uniform(k3, (HID_DIM, OUT_DIM), jnp.float32, -bound2, bound2)
    b2 = jax.random.uniform(k4, (1, OUT_DIM), jnp.float32, -bound2, bound2)
    return w1, b1, w2, b2


def _reference_bf16(x, w1, b1, w2, b2):
    # Same bf16-cast MXU operands as the kernel (f32 accumulate), so the only
    # difference vs the kernel is MXU accumulation order.
    x_bf = x.astype(jnp.bfloat16).astype(jnp.float32)
    w1_bf = w1.astype(jnp.bfloat16).astype(jnp.float32)
    h = jnp.maximum(x_bf @ w1_bf + b1, 0.0)
    h_bf = h.astype(jnp.bfloat16).astype(jnp.float32)
    w2_bf = w2.astype(jnp.bfloat16).astype(jnp.float32)
    return h_bf @ w2_bf + b2


if __name__ == "__main__":
    key = jax.random.PRNGKey(0)
    k_x, k_p = jax.random.split(key)

    w1, b1, w2, b2 = init_params(k_p)
    w1p, b1p, w2p, b2p = prepare_params(w1, b1, w2, b2)

    # Small batch: single grid step.
    B = 8
    x = jax.random.normal(k_x, (B, IN_DIM), jnp.float32)
    out = encoder_forward(x, w1p, b1p, w2p, b2p)
    out = jax.block_until_ready(out)
    assert out.shape == (B, OUT_DIM)

    ref = _reference_bf16(x, w1, b1, w2, b2)
    assert jnp.allclose(out, ref, atol=2e-3, rtol=2e-3), (
        float(jnp.max(jnp.abs(out - ref))))

    # Loose check against the strict f32 torch-style reference.
    ref_f32 = jnp.maximum(x @ w1 + b1, 0.0) @ w2 + b2
    assert jnp.allclose(out, ref_f32, atol=5e-2, rtol=5e-2)

    # Second case: multi-step grid with a partial last tile (B8 % tm != 0),
    # exercising the masked-writeback / discarded-rows path.
    B2 = 20
    x2 = jax.random.normal(jax.random.PRNGKey(1), (B2, IN_DIM), jnp.float32)
    out2 = encoder_forward(x2, w1p, b1p, w2p, b2p, tm=16)
    out2 = jax.block_until_ready(out2)
    assert out2.shape == (B2, OUT_DIM)
    ref2 = _reference_bf16(x2, w1, b1, w2, b2)
    assert jnp.allclose(out2, ref2, atol=2e-3, rtol=2e-3), (
        float(jnp.max(jnp.abs(out2 - ref2))))

    print("KERNEL_OK")
</pallas_src>

<mosaic_0001>
module attributes {stable_mosaic.version = 11 : i64} {
  func.func @encoder_kernel(%arg0: i32, %arg1: memref<8x784xf32, #tpu.memory_space<vmem>>, %arg2: memref<784x64xbf16, #tpu.memory_space<vmem>>, %arg3: memref<1x64xf32, #tpu.memory_space<vmem>>, %arg4: memref<64x128xbf16, #tpu.memory_space<vmem>>, %arg5: memref<1x128xf32, #tpu.memory_space<vmem>>, %arg6: memref<8x128xf32, #tpu.memory_space<vmem>>) attributes {dimension_semantics = [#tpu.dimension_semantics<parallel>], iteration_bounds = array<i64: 1>, scalar_prefetch = 0 : i64, scratch_operands = 0 : i64, tpu.core_type = #tpu.core_type<tc>, window_params = [{transform_indices = @transform_0, window_bounds = array<i64: 8, 784>}, {pipeline_mode = #tpu.pipeline_mode<synchronous>, transform_indices = @transform_1, window_bounds = array<i64: 784, 64>}, {pipeline_mode = #tpu.pipeline_mode<synchronous>, transform_indices = @transform_2, window_bounds = array<i64: 1, 64>}, {pipeline_mode = #tpu.pipeline_mode<synchronous>, transform_indices = @transform_3, window_bounds = array<i64: 64, 128>}, {pipeline_mode = #tpu.pipeline_mode<synchronous>, transform_indices = @transform_4, window_bounds = array<i64: 1, 128>}, {transform_indices = @transform_5, window_bounds = array<i64: 8, 128>}]} {
    %c0 = arith.constant 0 : index
    %c0_0 = arith.constant 0 : index
    %0 = vector.load %arg1[%c0, %c0_0] : memref<8x784xf32, #tpu.memory_space<vmem>>, vector<8x784xf32>
    %1 = arith.truncf %0 : vector<8x784xf32> to vector<8x784xbf16>
    %c0_1 = arith.constant 0 : index
    %c0_2 = arith.constant 0 : index
    %2 = vector.load %arg2[%c0_1, %c0_2] : memref<784x64xbf16, #tpu.memory_space<vmem>>, vector<784x64xbf16>
    %cst = arith.constant dense<0.000000e+00> : vector<8x64xf32>
    %3 = tpu.matmul %1, %2, %cst {dimension_numbers = #tpu.dot_dimension_numbers<[1], [0], [0], [1], [0, 0, 1, 1], [], []>} : vector<8x784xbf16>, vector<784x64xbf16>, vector<8x64xf32> -> vector<8x64xf32>
    %c0_3 = arith.constant 0 : index
    %c0_4 = arith.constant 0 : index
    %4 = vector.load %arg3[%c0_3, %c0_4] : memref<1x64xf32, #tpu.memory_space<vmem>>, vector<1x64xf32>
    %5 = vector.broadcast %4 : vector<1x64xf32> to vector<8x64xf32>
    %6 = arith.addf %3, %5 : vector<8x64xf32>
    %cst_5 = arith.constant 0.000000e+00 : f32
    %7 = vector.broadcast %cst_5 : f32 to vector<8x64xf32>
    %8 = arith.maximumf %6, %7 : vector<8x64xf32>
    %9 = arith.truncf %8 : vector<8x64xf32> to vector<8x64xbf16>
    %c0_6 = arith.constant 0 : index
    %c0_7 = arith.constant 0 : index
    %10 = vector.load %arg4[%c0_6, %c0_7] : memref<64x128xbf16, #tpu.memory_space<vmem>>, vector<64x128xbf16>
    %cst_8 = arith.constant dense<0.000000e+00> : vector<8x128xf32>
    %11 = tpu.matmul %9, %10, %cst_8 {dimension_numbers = #tpu.dot_dimension_numbers<[1], [0], [0], [1], [0, 0, 1, 1], [], []>} : vector<8x64xbf16>, vector<64x128xbf16>, vector<8x128xf32> -> vector<8x128xf32>
    %c0_9 = arith.constant 0 : index
    %c0_10 = arith.constant 0 : index
    %12 = vector.load %arg5[%c0_9, %c0_10] : memref<1x128xf32, #tpu.memory_space<vmem>>, vector<1x128xf32>
    %13 = vector.broadcast %12 : vector<1x128xf32> to vector<8x128xf32>
    %14 = arith.addf %11, %13 : vector<8x128xf32>
    %c0_11 = arith.constant 0 : index
    %c0_12 = arith.constant 0 : index
    %15 = vector.load %arg6[%c0_11, %c0_12] : memref<8x128xf32, #tpu.memory_space<vmem>>, vector<8x128xf32>
    tpu.vector_store %arg6[%c0_11, %c0_12], %14 {strides = array<i32>} : memref<8x128xf32, #tpu.memory_space<vmem>>, vector<8x128xf32>,
    return
  }
  func.func @transform_0(%arg0: i32) -> (i32, i32) {
    %c0_i32 = arith.constant 0 : i32
    %c0_i32_0 = arith.constant 0 : i32
    return %arg0, %c0_i32 : i32, i32
  }
  func.func @transform_1(%arg0: i32) -> (i32, i32) {
    %c0_i32 = arith.constant 0 : i32
    %c0_i32_0 = arith.constant 0 : i32
    %c0_i32_1 = arith.constant 0 : i32
    return %c0_i32, %c0_i32_0 : i32, i32
  }
  func.func @transform_2(%arg0: i32) -> (i32, i32) {
    %c0_i32 = arith.constant 0 : i32
    %c0_i32_0 = arith.constant 0 : i32
    %c0_i32_1 = arith.constant 0 : i32
    return %c0_i32, %c0_i32_0 : i32, i32
  }
  func.func @transform_3(%arg0: i32) -> (i32, i32) {
    %c0_i32 = arith.constant 0 : i32
    %c0_i32_0 = arith.constant 0 : i32
    %c0_i32_1 = arith.constant 0 : i32
    return %c0_i32, %c0_i32_0 : i32, i32
  }
  func.func @transform_4(%arg0: i32) -> (i32, i32) {
    %c0_i32 = arith.constant 0 : i32
    %c0_i32_0 = arith.constant 0 : i32
    %c0_i32_1 = arith.constant 0 : i32
    return %c0_i32, %c0_i32_0 : i32, i32
  }
  func.func @transform_5(%arg0: i32) -> (i32, i32) {
    %c0_i32 = arith.constant 0 : i32
    %c0_i32_0 = arith.constant 0 : i32
    return %arg0, %c0_i32 : i32, i32
  }
}

</mosaic_0001>

<bundles_post_ra>
// kernel: tpu_custom_call.1
= control target key start
LH: loop header
LB: loop body
LE: loop exit
PB: predicated region body
PF: predicated region fallthrough
CT: control target
= control target key end

     0   :  { %v927_v44 = vmov 0.0   ;;  %vm928_vm0 = vmmov 0   ;;  %vm435_vm1 = vcmask 130048   ;;  %s1160_s0 = inlined_call_operand.vmem [shape: f32[8,784], index: 0, kind: input, shape index: {}]   ;;  %s1161_s1 = inlined_call_operand.vmem [shape: bf16[784,64], index: 1, kind: input, shape index: {}]   ;;  %s1162_s2 = inlined_call_operand.vmem [shape: f32[1,64], index: 2, kind: input, shape index: {}]   ;;  %s1163_s3 = inlined_call_operand.vmem [shape: bf16[64,128], index: 3, kind: input, shape index: {}]   ;;  %s1164_s4 = inlined_call_operand.vmem [shape: f32[1,128], index: 4, kind: input, shape index: {}]   ;;  %s1165_s5 = inlined_call_operand.hbm [shape: f32[8,128], index: 5, kind: output, shape index: {}]  }
   0x1   :  { %v850_v0 = vld [vmem:[%s1161_s1 + $0x40] sm:$0xff]   ;;  %v854_v4 = vld [vmem:[%s1161_s1 + $0x48] sm:$0xff]   ;;  %v858_v8 = vld [vmem:[%s1161_s1 + $0x50] sm:$0xff]  }
   0x2   :  { %v851_v1 = vld [vmem:[%s1161_s1] sm:$0xff]   ;;  %756 = vmatprep.subr.bf16.mxu0 %v850_v0  ;;  %v855_v5 = vld [vmem:[%s1161_s1 + $0x8] sm:$0xff]   ;;  %v859_v9 = vld [vmem:[%s1161_s1 + $0x10] sm:$0xff]  }
   0x3   :  { %v852_v2 = vld [vmem:[%s1161_s1 + $0xc0] sm:$0xff]   ;;  %757 = vmatpush3.bf16.msra.mxu0 %v851_v1  ;;  %v856_v6 = vld [vmem:[%s1161_s1 + $0xc8] sm:$0xff]   ;;  %v860_v10 = vld [vmem:[%s1161_s1 + $0xd0] sm:$0xff]  }
   0x4   :  { %v853_v3 = vld [vmem:[%s1161_s1 + $0x80] sm:$0xff]   ;;  %778 = vmatprep.subr.bf16.mxu1 %v852_v2  ;;  %758 = vmatprep.subr.bf16.mxu0 %v854_v4  ;;  %v857_v7 = vld [vmem:[%s1161_s1 + $0x88] sm:$0xff]   ;;  %v861_v11 = vld [vmem:[%s1161_s1 + $0x90] sm:$0xff]  }
   0x5   :  { %779 = vmatpush3.bf16.msra.mxu1 %v853_v3  ;;  %v862_v12 = vld [vmem:[%s1161_s1 + $0x58] sm:$0xff]   ;;  %v866_v16 = vld [vmem:[%s1161_s1 + $0x60] sm:$0xff]   ;;  %v870_v20 = vld [vmem:[%s1161_s1 + $0x68] sm:$0xff]  }
   0x6   :  { %780 = vmatprep.subr.bf16.mxu1 %v856_v6  ;;  %v863_v13 = vld [vmem:[%s1161_s1 + $0x18] sm:$0xff]   ;;  %v867_v17 = vld [vmem:[%s1161_s1 + $0x20] sm:$0xff]   ;;  %v871_v21 = vld [vmem:[%s1161_s1 + $0x28] sm:$0xff]  }
   0x7   :  { %759 = vmatpush3.bf16.msra.mxu0 %v855_v5  ;;  %v864_v14 = vld [vmem:[%s1161_s1 + $0xd8] sm:$0xff]   ;;  %v868_v18 = vld [vmem:[%s1161_s1 + $0xe0] sm:$0xff]   ;;  %v872_v22 = vld [vmem:[%s1161_s1 + $0xe8] sm:$0xff]  }
   0x8   :  { %760 = vmatprep.subr.bf16.mxu0 %v858_v8  ;;  %v865_v15 = vld [vmem:[%s1161_s1 + $0x98] sm:$0xff]   ;;  %v869_v19 = vld [vmem:[%s1161_s1 + $0xa0] sm:$0xff]   ;;  %v873_v23 = vld [vmem:[%s1161_s1 + $0xa8] sm:$0xff]  }
   0x9   :  { %781 = vmatpush3.bf16.msra.mxu1 %v857_v7  ;;  %v874_v24 = vld [vmem:[%s1161_s1 + $0x70] sm:$0xff]   ;;  %v878_v28 = vld [vmem:[%s1161_s1 + $0x78] sm:$0xff]   ;;  %v23_v31 = vld [vmem:[%s1160_s0 + $0x8] sm:$0xff] }
   0xa   :  { %782 = vmatprep.subr.bf16.mxu1 %v860_v10  ;;  %v875_v25 = vld [vmem:[%s1161_s1 + $0x30] sm:$0xff]   ;;  %v879_v29 = vld [vmem:[%s1161_s1 + $0x38] sm:$0xff]   ;;  %v30_v32 = vpack.c.bf16 %v23_v31, %v23_v31  ;;  %v22_v34 = vld [vmem:[%s1160_s0] sm:$0xff] }
   0xb   :  { %761 = vmatpush3.bf16.msra.mxu0 %v859_v9  ;;  %v876_v26 = vld [vmem:[%s1161_s1 + $0xf0] sm:$0xff]   ;;  %v880_v30 = vld [vmem:[%s1161_s1 + $0xf8] sm:$0xff]   ;;  %v29_v35 = vpack.c.bf16 %v22_v34, %v22_v34  ;;  %v882_v36 = vld [vmem:[%s1161_s1 + $0x140] sm:$0xff]  }
   0xc   :  { %762 = vmatprep.subr.bf16.mxu0 %v862_v12  ;;  %v877_v27 = vld [vmem:[%s1161_s1 + $0xb0] sm:$0xff]   ;;  %v881_v33 = vld [vmem:[%s1161_s1 + $0xb8] sm:$0xff]   ;;  %471 = vmatprep.mubr.bf16.mxu0 %v30_v32  ;;  %v883_v39 = vld [vmem:[%s1161_s1 + $0x100] sm:$0xff]  }
   0xd   :  { %783 = vmatpush3.bf16.msra.mxu1 %v861_v11  ;;  %v25_v37 = vld [vmem:[%s1160_s0 + $0x18] sm:$0xff]  ;;  %v24_v40 = vld [vmem:[%s1160_s0 + $0x10] sm:$0xff]  ;;  %v884_v42 = vld [vmem:[%s1161_s1 + $0x148] sm:$0xff]  }
   0xe   :  { %784 = vmatprep.subr.bf16.mxu1 %v864_v14  ;;  %v32_v38 = vpack.c.bf16 %v25_v37, %v25_v37  ;;  %v31_v41 = vpack.c.bf16 %v24_v40, %v24_v40  ;;  %v885_v43 = vld [vmem:[%s1161_s1 + $0x108] sm:$0xff]   ;;  %v886_v45 = vld [vmem:[%s1161_s1 + $0x150] sm:$0xff]   ;;  %v888_v47 = vld [vmem:[%s1161_s1 + $0x158] sm:$0xff]  }
   0xf   :  { %763 = vmatpush3.bf16.msra.mxu0 %v863_v13  ;;  %v887_v46 = vld [vmem:[%s1161_s1 + $0x110] sm:$0xff]   ;;  %v889_v48 = vld [vmem:[%s1161_s1 + $0x118] sm:$0xff]   ;;  %v890_v49 = vld [vmem:[%s1161_s1 + $0x160] sm:$0xff]  }
  0x10   :  { %764 = vmatprep.subr.bf16.mxu0 %v866_v16  ;;  %511 = vmatprep.mubr.bf16.mxu1 %v32_v38  ;;  %v891_v50 = vld [vmem:[%s1161_s1 + $0x120] sm:$0xff]   ;;  %v892_v51 = vld [vmem:[%s1161_s1 + $0x168] sm:$0xff]   ;;  %v894_v55 = vld [vmem:[%s1161_s1 + $0x170] sm:$0xff]  }
  0x11   :  { %785 = vmatpush3.bf16.msra.mxu1 %v865_v15  ;;  %v893_v52 = vld [vmem:[%s1161_s1 + $0x128] sm:$0xff]   ;;  %v898_v53 = vld [vmem:[%s1161_s1 + $0x180] sm:$0xff]   ;;  %v28_v57 = vld [vmem:[%s1160_s0 + $0x30] sm:$0xff] }
  0x12   :  { %786 = vmatprep.subr.bf16.mxu1 %v868_v18  ;;  %v27_v54 = vld [vmem:[%s1160_s0 + $0x28] sm:$0xff]  ;;  %v35_v58 = vpack.c.bf16 %v28_v57, %v28_v57 }
  0x13   :  { %765 = vmatpush3.bf16.msra.mxu0 %v867_v17  ;;  %v34_v56 = vpack.c.bf16 %v27_v54, %v27_v54 }
  0x14   :  { %766 = vmatprep.subr.bf16.mxu0 %v870_v20 }
  0x15   :  { %787 = vmatpush3.bf16.msra.mxu1 %v869_v19 }
  0x16   :  { %788 = vmatprep.subr.bf16.mxu1 %v872_v22 }
  0x17   :  { %767 = vmatpush3.bf16.msra.mxu0 %v871_v21 }
  0x18   :  { %768 = vmatprep.subr.bf16.mxu0 %v874_v24 }
  0x19   :  { %789 = vmatpush3.bf16.msra.mxu1 %v873_v23 }
  0x1a   :  { %790 = vmatprep.subr.bf16.mxu1 %v876_v26 }
  0x1b   :  { %769 = vmatpush3.bf16.msra.mxu0 %v875_v25 }
  0x1c   :  { %770 = vmatprep.subr.bf16.mxu0 %v878_v28 }
  0x1d   :  { %791 = vmatpush3.bf16.msra.mxu1 %v877_v27 }
  0x1e   :  { %792 = vmatprep.subr.bf16.mxu1 %v880_v30 }
  0x1f   :  { %771 = vmatpush3.bf16.msra.mxu0 %v879_v29 }
  0x20   :  { %800 = vmatprep.subr.bf16.mxu0 %v882_v36 }
  0x21   :  { %793 = vmatpush3.bf16.msra.mxu1 %v881_v33 }
  0x22   :  { %472 = vmatmul.mubr.bf16.vlgmr.msra.gmra.mrb[0].mxu0 %v29_v35  ;;  %829 = vmatprep.subr.bf16.mxu1 %v927_v44 }
  0x23   :  { %801 = vmatpush3.bf16.msra.mxu0 %v883_v39  ;;  %551 = vmatprep.mubr.bf16.mxu0 %v34_v56 }
  0x24   :  { %512 = vmatmul.mubr.bf16.vlgmr.msra.gmra.mrb[0].mxu1 %v31_v41  ;;  %802 = vmatprep.subr.bf16.mxu0 %v884_v42 }
  0x25   :  { %831 = vmatprep.mubr.msk.bf16.mxu1 %vm928_vm0, %v927_v44  ;;  %830 = vmatpush3.bf16.msra.mxu1 %v898_v53 }
  0x26   :  { %835 = vmatprep.subr.bf16.mxu1 %v927_v44 }
  0x27   :  { %803 = vmatpush3.bf16.msra.mxu0 %v885_v43 }
  0x28   :  { %804 = vmatprep.subr.bf16.mxu0 %v886_v45 }
  0x2b   :  { %805 = vmatpush3.bf16.msra.mxu0 %v887_v46 }
  0x2c   :  { %806 = vmatprep.subr.bf16.mxu0 %v888_v47 }
  0x2f   :  { %807 = vmatpush3.bf16.msra.mxu0 %v889_v48 }
  0x30   :  { %808 = vmatprep.subr.bf16.mxu0 %v890_v49 }
  0x33   :  { %809 = vmatpush3.bf16.msra.mxu0 %v891_v50 }
  0x34   :  { %810 = vmatprep.subr.bf16.mxu0 %v892_v51 }
  0x35   :  { %10 = vsyncpa [#allocation3], 0  ;;  %832 = vmatmul.mubr.msk.bf16.vlgmr.msra.gmra.mrb[4].mxu1 %vm435_vm1, %v35_v58  ;;  %v895_v59 = vld [vmem:[%s1161_s1 + $0x130] sm:$0xff]   ;;  %v896_v60 = vld [vmem:[%s1161_s1 + $0x178] sm:$0xff]   ;;  %vm640_vm2 = vcmask 523264   ;;  %s929_s13 = smov [#allocation2]  }
  0x36   :  { %843 = vmatprep.mubr.msk.bf16.mxu1 %vm928_vm0, %v927_v44  ;;  %v897_v61 = vld [vmem:[%s1161_s1 + $0x138] sm:$0xff]   ;;  %v26_v62 = vld [vmem:[%s1160_s0 + $0x20] sm:$0xff]  ;;  %v900_v1 = vld [vmem:[%s1163_s3 + $0x8] sm:$0xff]   ;;  %s691_s14 = sshll.u32 %s929_s13, 4  ;;  %s692_s14 = int_to_ptr.vmem [resolvable:$true] %s691_s14 }
  0x37   :  { %811 = vmatpush3.bf16.msra.mxu0 %v893_v52  ;;  %v33_v63 = vpack.c.bf16 %v26_v62, %v26_v62  ;;  %v899_v0 = vld [vmem:[%s1163_s3] sm:$0xff]   ;;  %v901_v2 = vld [vmem:[%s1163_s3 + $0x10] sm:$0xff]   ;;  %v902_v3 = vld [vmem:[%s1163_s3 + $0x18] sm:$0xff]   ;;  %s903_s15 = scalar_lea.vmem %s692_s14, 128  ;;  %p908_p1 = scmp.lt.s32.totalorder %s692_s14, %s692_s14 }
  0x38   :  { %812 = vmatprep.subr.bf16.mxu0 %v894_v55  ;;  %836 = vmatpush3.bf16.msra.mxu1 %v899_v0  ;;  %v699_v5 = vld [vmem:[%s1162_s2] ss:$0 sm:$0xff]  ;;  %p904_p0 = scmp.ne.s32.totalorder %s692_s14, %s903_s15  ;;  %p909_p2 = scmp.lt.s32.totalorder %s903_s15, %s903_s15 }
  0x39   :  { %837 = vmatprep.subr.bf16.mxu1 %v927_v44  ;;  %v750_v30 = vld [vmem:[%s1164_s4] ss:$0 sm:$0xff] }
  0x3a   :  { %p910_p3 = por %p909_p2, %p908_p1 }
  0x3b   :  { %813 = vmatpush3.bf16.msra.mxu0 %v895_v59 }
  0x3c   :  { %814 = vmatprep.subr.bf16.mxu0 %v896_v60  ;;  %838 = vmatpush3.bf16.msra.mxu1 %v900_v1  ;;  %p911_p4 = pnand %p910_p3, %p904_p0 }
  0x3d   :  { %839 = vmatprep.subr.bf16.mxu1 %v927_v44 }
  0x3f   :  { %815 = vmatpush3.bf16.msra.mxu0 %v897_v61 }
  0x40   :  { %840 = vmatpush3.bf16.msra.mxu1 %v901_v2 }
  0x41   :  { %841 = vmatprep.subr.bf16.mxu1 %v927_v44 }
  0x42   :  { %552 = vmatmul.mubr.bf16.vlgmr.msra.gmra.mrb[4].mxu0 %v33_v63 }
  0x44   :  { %842 = vmatpush3.bf16.msra.mxu1 %v902_v3 }
  0xf5   :  { %v772_v4 = vpop.f32.mrb[0].mxu0 }
  0xf6   :  { %v773_v6 = vpop.f32.mrb[1].mxu0 }
  0xf7   :  { %v774_v7 = vadd.f32 %v773_v6, %v772_v4  ;;  %v775_v8 = vpop.f32.mrb[2].mxu0  ;;  %v794_v9 = vpop.f32.mrb[0].mxu1 }
  0xf8   :  { %v776_v10 = vpop.f32.mrb[3].mxu0  ;;  %v795_v12 = vpop.f32.mrb[1].mxu1 }
  0xf9   :  { %v474_v11 = vadd.f32 %v774_v7, %v699_v5  ;;  %v796_v13 = vadd.f32 %v795_v12, %v794_v9  ;;  %v797_v14 = vpop.f32.mrb[2].mxu1 }
  0xfa   :  { %v798_v15 = vpop.f32.mrb[3].mxu1 }
  0xfb   :  { %v514_v16 = vadd.f32 %v796_v13, %v474_v11 }
 0x108   :  { %v593_v17 = vpop.f32.mrb[4].mxu1 }
 0x109   :  { %v833_v18 = vpop.f32.mrb[5].mxu1 }
 0x10a   :  { %v596_v19 = vpop.f32.mrb[6].mxu1 }
 0x10b   :  { %v834_v20 = vpop.f32.mrb[7].mxu1 }
 0x115   :  { %v816_v21 = vpop.f32.mrb[4].mxu0 }
 0x116   :  { %v817_v22 = vpop.f32.mrb[5].mxu0 }
 0x117   :  { %v818_v23 = vadd.f32 %v817_v22, %v816_v21  ;;  %v819_v24 = vpop.f32.mrb[6].mxu0 }
 0x118   :  { %v820_v25 = vpop.f32.mrb[7].mxu0 }
 0x119   :  { %v554_v26 = vadd.f32 %v818_v23, %v514_v16 }
 0x11b   :  { %v594_v27 = vadd.f32 %v593_v17, %v554_v26 }
 0x11d   :  { %v599_v28 = vmax.f32 %v594_v27, 0.0 }
 0x11f   :  { %v600_v29 = vpack.c.bf16 %v599_v28, %v599_v28 }
 0x121   :  { %844 = vmatmul.mubr.msk.bf16.vlgmr.msra.gmra.mrb[8].mxu1 %vm640_vm2, %v600_v29 }
 0x1f4   :  { %v678_v31 = vpop.f32.mrb[8].mxu1 }
 0x1f5   :  { %v679_v32 = vadd.f32 %v750_v30, %v678_v31  ;;  %v845_v33 = vpop.f32.mrb[9].mxu1 }
 0x1f6   :  { %v681_v34 = vpop.f32.mrb[10].mxu1 }
 0x1f7   :  { %684 = vst [vmem:[#allocation2] sm:$0xff] %v679_v32  ;;  %v846_v35 = vpop.f32.mrb[11].mxu1 }
 0x1f8   :  { %914 = shalt.err (!%p911_p4)
}
 0x1f9   :  { %s915_s4 = scalar_lea.hbm %s1165_s5, 128 }
 0x1fa   :  { %p916_p5 = scmp.ne.s32.totalorder %s1165_s5, %s915_s4  ;;  %p919_p6 = scmp.lt.u32.totalorder %s915_s4, %s1165_s5 }
 0x1fc   :  { %p921_p7 = pnand %p919_p6, %p916_p5 }
 0x1fe   :  { %924 = shalt.err (!%p921_p7)
}
 0x1ff   :  { %694 = dma.vmem_to_hbm [thread:$0]  %s692_s14, 128, %s1165_s5, [#allocation3]  }
 0x200   :  { %925 = dma.done.wait [#allocation3], 128  }
 0x201   :  { %926 = vsyncadd [#allocation3], 4294967168 }
 0x202   :  { %698 = vsyncpa [#allocation3], 1 }

</bundles_post_ra>
